<compile_context>
chip_gen: v6e
topology: v6e:2x2x1
jax: 0.10.0
libtpu: 0.0.40
codegen_flags: <defaults>
</compile_context>

<pallas_src>
import functools

import jax
import jax.numpy as jnp
from jax.experimental import pallas as pl
from jax.experimental.pallas import tpu as pltpu

_LANES = 128           # vreg lane width (last-dim layout unit)
_SUBLANES = 8          # vreg sublane height (second-to-last layout unit)
_MAX_TILE_ROWS = 4096  # (4096, 128) f32 = 2 MiB per buffer


def _poly_linear_kernel(x_ref, w_ref, b_ref, o_ref, *, degree: int):
    """Fused polynomial features + Linear(degree, 1) on one (tile_rows, 128) tile.

    x_ref: (tile_rows, 128) f32 VMEM   lane-dense batch tile
    w_ref: (degree,)        f32 SMEM   Linear weight (row-major of (1, degree))
    b_ref: (1,)             f32 SMEM   Linear bias
    """
    x = x_ref[...]
    b = b_ref[0]
    if degree == 1:
        o_ref[...] = x * w_ref[0] + b
        return
    # Horner:  w[0]*x + w[1]*x^2 + ... + w[d-1]*x^d + b
    #        = ((...((w[d-1]*x + w[d-2])*x + w[d-3])*x ... + w[0]) * x) + b
    acc = x * w_ref[degree - 1] + w_ref[degree - 2]
    for i in range(degree - 3, -1, -1):   # degree is static -> fully unrolled
        acc = acc * x + w_ref[i]
    o_ref[...] = acc * x + b


def _round_up(v: int, m: int) -> int:
    return ((v + m - 1) // m) * m


def polynomial_model(x, weight, bias, degree: int):
    """x: (N,) f32; weight: (1, degree) f32; bias: (1,) f32  ->  (N, 1) f32."""
    n = x.shape[0]
    x_flat = x.reshape(n).astype(jnp.float32)
    w_flat = weight.reshape(degree).astype(jnp.float32)
    b_flat = bias.reshape(1).astype(jnp.float32)

    # Lane-dense (rows, 128) view of the batch.  When N is a multiple of 128
    # this is a metadata-only reshape (no pad pass, no tail-slice pass);
    # otherwise pad only the <128-element tail.
    if n % _LANES == 0:
        n_pad = n
        x2 = x_flat.reshape(n // _LANES, _LANES)
    else:
        n_pad = _round_up(n, _LANES)
        x2 = jnp.pad(x_flat, (0, n_pad - n)).reshape(n_pad // _LANES, _LANES)
    rows = n_pad // _LANES

    # Tile selection:
    #   * small inputs -> one full-extent block (any row count is legal when
    #     the block equals the array extent);
    #   * otherwise a multiple-of-8 row tile capped at 2 MiB, sized so the
    #     grid has >= 2 steps (lets "parallel" use both v7x TensorCores).
    #     The last block may be partial: Pallas masks the OOB stores.
    if rows <= 2 * _SUBLANES:
        tile_rows = rows
    else:
        tile_rows = min(_MAX_TILE_ROWS, _round_up(pl.cdiv(rows, 2), _SUBLANES))
    num_blocks = pl.cdiv(rows, tile_rows)

    out = pl.pallas_call(
        functools.partial(_poly_linear_kernel, degree=degree),
        out_shape=jax.ShapeDtypeStruct((rows, _LANES), jnp.float32),
        grid=(num_blocks,),
        in_specs=[
            # x tile (default double buffering; switch to pipeline_mode=
            # pl.Buffered(3) only if a profile still shows exposed input DMA).
            pl.BlockSpec((tile_rows, _LANES), lambda i: (i, 0)),
            pl.BlockSpec(memory_space=pltpu.MemorySpace.SMEM),   # weight
            pl.BlockSpec(memory_space=pltpu.MemorySpace.SMEM),   # bias
        ],
        out_specs=pl.BlockSpec((tile_rows, _LANES), lambda i: (i, 0)),
        compiler_params=pltpu.CompilerParams(
            dimension_semantics=("parallel",)),
        cost_estimate=pl.CostEstimate(
            flops=2 * degree * n,
            transcendentals=0,
            bytes_accessed=8 * n),
    )(x2, w_flat, b_flat)

    if n % _LANES == 0:
        return out.reshape(n, 1)                      # metadata-only reshape
    return out.reshape(n_pad)[:n].reshape(n, 1)       # drop the padded tail


def polynomial_model_ref(x, weight, bias, degree: int):
    """Pure-JAX reference matching the PyTorch forward exactly."""
    xs = x.reshape(-1, 1)
    feats = jnp.concatenate([xs ** i for i in range(1, degree + 1)], axis=1)
    return feats @ weight.T + bias


if __name__ == "__main__":
    degree = 4

    key = jax.random.PRNGKey(0)
    kw, kb, k1, k2, k3, k4 = jax.random.split(key, 6)

    # nn.Linear(degree, 1): W (1, degree), b (1,).
    bound = 1.0 / jnp.sqrt(jnp.float32(degree))
    weight = jax.random.uniform(kw, (1, degree), jnp.float32, -bound, bound)
    bias = jax.random.uniform(kb, (1,), jnp.float32, -bound, bound)

    # N=8       : tiny, padded tail path, single block
    # N=300     : non-multiple-of-128 padded tail path
    # N=512     : multiple of 128 -> no pad / no tail slice, single block
    # N=5120    : multiple of 128, multi-step grid with a partial last block
    for kk, n in ((k1, 8), (k2, 300), (k3, 512), (k4, 5120)):
        x = jax.random.normal(kk, (n,), jnp.float32)

        y = polynomial_model(x, weight, bias, degree)
        y = jax.block_until_ready(y)

        y_ref = polynomial_model_ref(x, weight, bias, degree)
        assert y.shape == (n, 1)
        assert jnp.allclose(y, y_ref, atol=1e-5, rtol=1e-5)

    print("KERNEL_OK")
</pallas_src>

<mosaic_0001>
module attributes {stable_mosaic.version = 11 : i64} {
  func.func @_poly_linear_kernel(%arg0: i32, %arg1: memref<1x128xf32, #tpu.memory_space<vmem>>, %arg2: memref<4xf32, #tpu.memory_space<smem>>, %arg3: memref<1xf32, #tpu.memory_space<smem>>, %arg4: memref<1x128xf32, #tpu.memory_space<vmem>>) attributes {dimension_semantics = [#tpu.dimension_semantics<parallel>], iteration_bounds = array<i64: 1>, scalar_prefetch = 0 : i64, scratch_operands = 0 : i64, tpu.core_type = #tpu.core_type<tc>, window_params = [{transform_indices = @transform_0, window_bounds = array<i64: 1, 128>}, {transform_indices = @transform_1, window_bounds = array<i64: 4>}, {transform_indices = @transform_2, window_bounds = array<i64: 1>}, {transform_indices = @transform_3, window_bounds = array<i64: 1, 128>}]} {
    %c0 = arith.constant 0 : index
    %c0_0 = arith.constant 0 : index
    %0 = vector.load %arg1[%c0, %c0_0] : memref<1x128xf32, #tpu.memory_space<vmem>>, vector<1x128xf32>
    %c0_1 = arith.constant 0 : index
    %1 = memref.load %arg3[%c0_1] : memref<1xf32, #tpu.memory_space<smem>>
    %c3 = arith.constant 3 : index
    %2 = memref.load %arg2[%c3] : memref<4xf32, #tpu.memory_space<smem>>
    %3 = vector.broadcast %2 : f32 to vector<1x128xf32>
    %4 = arith.mulf %0, %3 : vector<1x128xf32>
    %c2 = arith.constant 2 : index
    %5 = memref.load %arg2[%c2] : memref<4xf32, #tpu.memory_space<smem>>
    %6 = vector.broadcast %5 : f32 to vector<1x128xf32>
    %7 = arith.addf %4, %6 : vector<1x128xf32>
    %8 = arith.mulf %7, %0 : vector<1x128xf32>
    %c1 = arith.constant 1 : index
    %9 = memref.load %arg2[%c1] : memref<4xf32, #tpu.memory_space<smem>>
    %10 = vector.broadcast %9 : f32 to vector<1x128xf32>
    %11 = arith.addf %8, %10 : vector<1x128xf32>
    %12 = arith.mulf %11, %0 : vector<1x128xf32>
    %c0_2 = arith.constant 0 : index
    %13 = memref.load %arg2[%c0_2] : memref<4xf32, #tpu.memory_space<smem>>
    %14 = vector.broadcast %13 : f32 to vector<1x128xf32>
    %15 = arith.addf %12, %14 : vector<1x128xf32>
    %16 = arith.mulf %15, %0 : vector<1x128xf32>
    %17 = vector.broadcast %1 : f32 to vector<1x128xf32>
    %18 = arith.addf %16, %17 : vector<1x128xf32>
    %c0_3 = arith.constant 0 : index
    %c0_4 = arith.constant 0 : index
    %19 = vector.load %arg4[%c0_3, %c0_4] : memref<1x128xf32, #tpu.memory_space<vmem>>, vector<1x128xf32>
    tpu.vector_store %arg4[%c0_3, %c0_4], %18 {strides = array<i32>} : memref<1x128xf32, #tpu.memory_space<vmem>>, vector<1x128xf32>,
    return
  }
  func.func @transform_0(%arg0: i32) -> (i32, i32) {
    %c0_i32 = arith.constant 0 : i32
    %c0_i32_0 = arith.constant 0 : i32
    return %arg0, %c0_i32 : i32, i32
  }
  func.func @transform_1(%arg0: i32) -> i32 {
    %c0_i32 = arith.constant 0 : i32
    %c0_i32_0 = arith.constant 0 : i32
    return %c0_i32 : i32
  }
  func.func @transform_2(%arg0: i32) -> i32 {
    %c0_i32 = arith.constant 0 : i32
    %c0_i32_0 = arith.constant 0 : i32
    return %c0_i32 : i32
  }
  func.func @transform_3(%arg0: i32) -> (i32, i32) {
    %c0_i32 = arith.constant 0 : i32
    %c0_i32_0 = arith.constant 0 : i32
    return %arg0, %c0_i32 : i32, i32
  }
}

</mosaic_0001>

<bundles_post_ra>
// kernel: tpu_custom_call.1
= control target key start
LH: loop header
LB: loop body
LE: loop exit
PB: predicated region body
PF: predicated region fallthrough
CT: control target
= control target key end

     0   :  { %9 = vsyncpa [#allocation5], 0  ;;  %s139_s0 = inlined_call_operand.vmem [shape: f32[1,128], index: 0, kind: input, shape index: {}]   ;;  %s140_s1 = inlined_call_operand.vmem [shape: f32[4], index: 1, kind: input, shape index: {}]   ;;  %s141_s2 = inlined_call_operand.<no memory space> [shape: f32[1], index: 2, kind: input, shape index: {}]   ;;  %s142_s3 = inlined_call_operand.hbm [shape: f32[1,128], index: 3, kind: output, shape index: {}]  }
   0x1   :  { %10 = vsyncpa [#allocation4], 0  ;;  %s19_s14 = sshll.u32 %s140_s1, 4  ;;  %s20_s14 = int_to_ptr.vmem [resolvable:$true] %s19_s14 }
   0x2   :  { %s69_s15 = scalar_lea.vmem %s20_s14, 16  ;;  %p74_p1 = scmp.lt.s32.totalorder %s20_s14, %s20_s14 }
   0x3   :  { %p70_p0 = scmp.ne.s32.totalorder %s20_s14, %s69_s15  ;;  %p75_p2 = scmp.lt.s32.totalorder %s69_s15, %s69_s15 }
   0x5   :  { %p76_p3 = por %p75_p2, %p74_p1 }
   0x7   :  { %p77_p4 = pnand %p76_p3, %p70_p0 }
   0x9   :  { %80 = shalt.err (!%p77_p4)
}
   0xa   :  { %s105_s16 = smov [#allocation3]  }
   0xb   :  { %22 = dma.vmem_to_smem %s20_s14, 16, %s105_s16, [#allocation5]  }
   0xc   :  { %101 = dma.done.wait [#allocation5], 16  }
   0xd   :  { %102 = vsyncadd [#allocation5], 4294967280 }
   0xe   :  { %28 = sfence }
   0xf   :  { %s64_s17 = sld [smem:[#allocation3 + $0x3]]  ;;  %v29_v0 = vld [vmem:[%s139_s0] sm:$0x1]  ;;  %v46_v11 = vstv %s141_s2  ;;  %s106_s24 = smov [#allocation6]  }
  0x10   :  { %s65_s18 = sld [smem:[#allocation3 + $0x2]]  ;;  %s55_s25 = sshll.u32 %s106_s24, 4  ;;  %s56_s25 = int_to_ptr.vmem [resolvable:$true] %s55_s25 }
  0x11   :  { %s66_s19 = sld [smem:[#allocation3 + $0x1]]  ;;  %s81_s0 = scalar_lea.vmem %s56_s25, 16 }
  0x12   :  { %s42_s1 = sld [smem:[#allocation3]]  ;;  %p82_p5 = scmp.ne.s32.totalorder %s56_s25, %s81_s0 }
  0x13   :  { %s85_s26 = scalar_lea.vmem %s56_s25, 32  ;;  %p86_p6 = scmp.lt.s32.totalorder %s56_s25, %s56_s25 }
  0x14   :  { %p87_p7 = scmp.lt.s32.totalorder %s85_s26, %s81_s0 }
  0x15   :  { %v32_v1 = vstv %s64_s17 }
  0x16   :  { %v33_v2 = vmul.f32 %v32_v1, %v29_v0  ;;  %v35_v3 = vstv %s65_s18  ;;  %p88_p8 = por %p87_p7, %p86_p6 }
  0x17   :  { %v39_v5 = vstv %s66_s19 }
  0x18   :  { %v36_v4 = vadd.f32 %v35_v3, %v33_v2  ;;  %v43_v8 = vstv %s42_s1  ;;  %p89_p9 = pnand %p88_p8, %p82_p5 }
  0x1a   :  { %v37_v6 = vmul.f32 %v36_v4, %v29_v0 }
  0x1c   :  { %v40_v7 = vadd.f32 %v39_v5, %v37_v6 }
  0x1e   :  { %v41_v9 = vmul.f32 %v40_v7, %v29_v0 }
  0x20   :  { %v44_v10 = vadd.f32 %v43_v8, %v41_v9 }
  0x22   :  { %v45_v12 = vmul.f32 %v44_v10, %v29_v0 }
  0x24   :  { %v47_v13 = vadd.f32 %v46_v11, %v45_v12 }
  0x26   :  { %48 = vst [vmem:[#allocation6] sm:$0x1] %v47_v13 }
  0x27   :  { %92 = shalt.err (!%p89_p9)
}
  0x28   :  { %58 = dma.vmem_to_hbm [thread:$0]  %s56_s25, 16, %s142_s3, [#allocation4]  }
  0x29   :  { %103 = dma.done.wait [#allocation4], 16  }
  0x2a   :  { %104 = vsyncadd [#allocation4], 4294967280 }
  0x2b   :  { %62 = vsyncpa [#allocation4], 1 }
  0x2c   :  { %63 = vsyncpa [#allocation5], 1 }

</bundles_post_ra>
